<compile_context>
chip_gen: v7x
topology: tpu7x:2x2x1
jax: 0.10.0
libtpu: 0.0.40
codegen_flags: <defaults>
</compile_context>

<pallas_src>
import jax
import jax.numpy as jnp
from jax.experimental import pallas as pl
from jax.experimental.pallas import tpu as pltpu


def _cdiv(a, b):
    return -(-a // b)


def _round_up(a, b):
    return _cdiv(a, b) * b


def _fold_rows_static(C):
    """Number of sublane rows the per-block partials are folded down to."""
    return 8 if (C > 8 and C % 8 == 0) else C


def _fold_sublanes(x):
    """Fold a (C, tile_m) f32 slab down to (<=8, tile_m) using aligned static
    sublane slices (pure VALU adds) so the carried accumulators -- and their
    per-element load/store traffic -- shrink 4x for C = 32."""
    c = x.shape[0]
    if c <= 8 or c % 8 != 0:
        return x
    acc = x[0:8]
    for k in range(1, c // 8):
        acc = acc + x[k * 8:(k + 1) * 8]
    return acc


def _make_kernel(M, tile_m, tiles_per_split, needs_tail_mask):
    def kernel(pred_ref, target_ref, mask_ref, out_ref, err_acc, mask_acc):
        j = pl.program_id(1)

        @pl.when(j == 0)
        def _init():
            err_acc[...] = jnp.zeros_like(err_acc)
            mask_acc[...] = jnp.zeros_like(mask_acc)

        # Cast to f32 in-kernel (inputs may be bf16 / bool); cast BEFORE the diff.
        p = pred_ref[...].astype(jnp.float32)
        t = target_ref[...].astype(jnp.float32)
        m = mask_ref[...].astype(jnp.float32)
        d = p - t

        if needs_tail_mask:  # static Python branch: only emitted for ragged M
            c = pl.program_id(0)
            start = (c * tiles_per_split + j) * tile_m
            lane = jax.lax.broadcasted_iota(jnp.int32, (1, 1, tile_m), 2)
            valid = lane < (M - start)
            # where (select), not multiply: unspecified padding (even NaN/inf)
            # must not reach either sum.
            d = jnp.where(valid, d, 0.0)
            m = jnp.where(valid, m, 0.0)

        e = d * d * m
        # Sum over the batch axis (plain VPU add of B slabs), fold C rows to
        # <= 8 sublanes, then a single elementwise accumulate per array.  The
        # expensive cross-lane reduce runs once, in the finalize branch.
        err_acc[...] += _fold_sublanes(jnp.sum(e, axis=0))
        mask_acc[...] += _fold_sublanes(jnp.sum(m, axis=0))

        @pl.when(j == tiles_per_split - 1)
        def _finalize():
            out_ref[0, 0] = jnp.sum(err_acc[...])
            out_ref[0, 1] = jnp.sum(mask_acc[...])

    return kernel


def _choose_tiling(B, C, M, in_bytes_per_col, budget_bytes, single_step_bytes):
    """Returns (tile_m, nsplit, tiles_per_split)."""
    total_bytes = M * in_bytes_per_col
    if M <= 128 or total_bytes <= single_step_bytes:
        # Tiny array (or not lane-tileable): one step, whole thing in VMEM.
        # TODO(synk): M < 128 with an enormous B*C would need a sublane-tiled
        # path; out of scope for the module's (1, 32, mult) shapes.
        return M, 1, 1

    fold = _fold_rows_static(C)
    # Per lane-column bytes: double-buffered inputs + two f32 accumulators.
    per_col = 2 * in_bytes_per_col + 2 * fold * 4
    max_tile = max(128, (budget_bytes // per_col) // 128 * 128)
    # Aim for >= 8 grid steps so the next block's DMA hides the VPU work.
    desired = _round_up(_cdiv(M, 8), 128)
    tile_m = max(128, min(max_tile, desired))

    num_tiles = _cdiv(M, tile_m)
    if num_tiles >= 2 and num_tiles % 2 == 1:
        # Nudge to an even tile count so the M range splits cleanly across the
        # two v7x TensorCores (no effect on 1-TC v5e/v6e).
        alt = _round_up(_cdiv(M, num_tiles + 1), 128)
        if alt >= 128 and _cdiv(M, alt) % 2 == 0:
            tile_m, num_tiles = alt, _cdiv(M, alt)

    nsplit = 2 if num_tiles % 2 == 0 else 1
    return tile_m, nsplit, num_tiles // nsplit


def midas_mse_loss(prediction, target, mask, *,
                   vmem_budget_bytes=8 * 1024 * 1024,
                   single_step_bytes=2 * 1024 * 1024):
    """MiDaS MSE loss, reduction_type='batch'.

    prediction/target: float (B, C, M); mask: bool/float (B, C, M).
    Returns a scalar float32 loss."""
    assert prediction.ndim == 3
    assert target.shape == prediction.shape and mask.shape == prediction.shape
    B, C, M = prediction.shape

    itemsizes = (jnp.dtype(prediction.dtype).itemsize
                 + jnp.dtype(target.dtype).itemsize
                 + jnp.dtype(mask.dtype).itemsize)
    in_bytes_per_col = B * C * itemsizes
    tile_m, nsplit, tiles_per_split = _choose_tiling(
        B, C, M, in_bytes_per_col, vmem_budget_bytes, single_step_bytes)
    needs_tail_mask = (M % tile_m) != 0
    fold = _fold_rows_static(C)

    kernel = _make_kernel(M, tile_m, tiles_per_split, needs_tail_mask)
    in_spec = pl.BlockSpec(
        (B, C, tile_m), lambda c, j: (0, 0, c * tiles_per_split + j))

    partials = pl.pallas_call(
        kernel,
        out_shape=jax.ShapeDtypeStruct((nsplit, 2), jnp.float32),
        grid_spec=pltpu.PrefetchScalarGridSpec(
            num_scalar_prefetch=0,
            grid=(nsplit, tiles_per_split),
            in_specs=[in_spec, in_spec, in_spec],
            out_specs=pl.BlockSpec((1, 2), lambda c, j: (c, 0),
                                   memory_space=pltpu.SMEM),
            scratch_shapes=[
                pltpu.VMEM((fold, tile_m), jnp.float32),  # masked sq-err partials
                pltpu.VMEM((fold, tile_m), jnp.float32),  # mask-count partials
            ],
        ),
        # Leading axis splits the M range across v7x's two TensorCores; the
        # trailing (accumulating) lane-tile axis stays "arbitrary".
        compiler_params=pltpu.CompilerParams(
            dimension_semantics=("parallel", "arbitrary")),
        cost_estimate=pl.CostEstimate(
            flops=8 * B * C * M,
            transcendentals=0,
            bytes_accessed=B * C * M * itemsizes),
    )(prediction, target, mask)

    # Combine the per-core partials and apply the 0-divisor guard (tiny XLA op).
    err_sum = jnp.sum(partials[:, 0])
    divisor = 2.0 * jnp.sum(partials[:, 1])
    return jnp.where(divisor == 0.0, 0.0, err_sum / divisor)


def _reference_loss(prediction, target, mask):
    p = prediction.astype(jnp.float32)
    t = target.astype(jnp.float32)
    m = mask.astype(jnp.float32)
    err = jnp.sum((p - t) ** 2 * m)
    divisor = 2.0 * jnp.sum(m)
    return jnp.where(divisor == 0.0, 0.0, err / divisor)


if __name__ == "__main__":
    key = jax.random.PRNGKey(0)
    k1, k2, k3 = jax.random.split(key, 3)

    B, C, MULT = 1, 32, 256  # matches the '1 32 mult' annotation
    prediction = jax.random.normal(k1, (B, C, MULT), dtype=jnp.float32)
    target = jax.random.normal(k2, (B, C, MULT), dtype=jnp.float32)
    mask = jax.random.bernoulli(k3, 0.7, (B, C, MULT))  # bool, like the module

    # 1) default path: small array -> single grid step, bool mask cast in-kernel
    loss = jax.block_until_ready(midas_mse_loss(prediction, target, mask))
    ref = _reference_loss(prediction, target, mask)
    assert jnp.allclose(loss, ref, rtol=1e-5, atol=1e-6), (loss, ref)

    # 2) force the pipelined multi-step / 2-way-split path (grid (2, 1) here)
    loss_tiled = jax.block_until_ready(
        midas_mse_loss(prediction, target, mask, single_step_bytes=0))
    assert jnp.allclose(loss_tiled, ref, rtol=1e-5, atol=1e-6), (loss_tiled, ref)

    # 3) ragged M (not a multiple of 128) through the tail-masked tiled path
    Mr = 1000
    k4, k5, k6 = jax.random.split(jax.random.PRNGKey(1), 3)
    pred_r = jax.random.normal(k4, (B, C, Mr), dtype=jnp.float32)
    tgt_r = jax.random.normal(k5, (B, C, Mr), dtype=jnp.float32)
    mask_r = jax.random.bernoulli(k6, 0.5, (B, C, Mr))
    loss_r = jax.block_until_ready(
        midas_mse_loss(pred_r, tgt_r, mask_r, single_step_bytes=0))
    ref_r = _reference_loss(pred_r, tgt_r, mask_r)
    assert jnp.allclose(loss_r, ref_r, rtol=1e-5, atol=1e-6), (loss_r, ref_r)

    # 4) bf16 prediction/target: casts stay inside the kernel, f32 accumulate
    pred_bf = prediction.astype(jnp.bfloat16)
    tgt_bf = target.astype(jnp.bfloat16)
    loss_bf = jax.block_until_ready(midas_mse_loss(pred_bf, tgt_bf, mask))
    ref_bf = _reference_loss(pred_bf, tgt_bf, mask)
    assert jnp.allclose(loss_bf, ref_bf, rtol=1e-4, atol=1e-5), (loss_bf, ref_bf)

    # 5) all-invalid mask -> divisor == 0 -> loss == 0
    zero_mask = jnp.zeros((B, C, MULT), dtype=jnp.bool_)
    loss_zero = jax.block_until_ready(
        midas_mse_loss(prediction, target, zero_mask))
    assert jnp.allclose(loss_zero, 0.0), loss_zero

    print("KERNEL_OK")
</pallas_src>

<mosaic_0001>
module attributes {stable_mosaic.version = 11 : i64} {
  func.func @kernel(%arg0: i32, %arg1: i32, %arg2: memref<1x32x256xf32, #tpu.memory_space<vmem>>, %arg3: memref<1x32x256xf32, #tpu.memory_space<vmem>>, %arg4: memref<1x32x256xi32, #tpu.memory_space<vmem>>, %arg5: memref<1x2xf32, #tpu.memory_space<smem>>, %arg6: memref<8x256xf32, #tpu.memory_space<vmem>>, %arg7: memref<8x256xf32, #tpu.memory_space<vmem>>) attributes {dimension_semantics = [#tpu.dimension_semantics<parallel>, #tpu.dimension_semantics<arbitrary>], iteration_bounds = array<i64: 1, 1>, scalar_prefetch = 0 : i64, scratch_operands = 2 : i64, tpu.core_type = #tpu.core_type<tc>, window_params = [{transform_indices = @transform_0, window_bounds = array<i64: 1, 32, 256>}, {transform_indices = @transform_1, window_bounds = array<i64: 1, 32, 256>}, {transform_indices = @transform_2, window_bounds = array<i64: 1, 32, 256>}, {transform_indices = @transform_3, window_bounds = array<i64: 1, 2>}]} {
    %c0_i32 = arith.constant 0 : i32
    %0 = arith.cmpi eq, %arg1, %c0_i32 : i32
    %1 = arith.extui %0 : i1 to i32
    %c0_i32_0 = arith.constant 0 : i32
    %2 = arith.cmpi ne, %1, %c0_i32_0 : i32
    scf.if %2 {
      %cst_21 = arith.constant 0.000000e+00 : f32
      %37 = vector.broadcast %cst_21 : f32 to vector<8x256xf32>
      %c0_22 = arith.constant 0 : index
      %c0_23 = arith.constant 0 : index
      %38 = vector.load %arg6[%c0_22, %c0_23] : memref<8x256xf32, #tpu.memory_space<vmem>>, vector<8x256xf32>
      tpu.vector_store %arg6[%c0_22, %c0_23], %37 {strides = array<i32>} : memref<8x256xf32, #tpu.memory_space<vmem>>, vector<8x256xf32>,
      %cst_24 = arith.constant 0.000000e+00 : f32
      %39 = vector.broadcast %cst_24 : f32 to vector<8x256xf32>
      %c0_25 = arith.constant 0 : index
      %c0_26 = arith.constant 0 : index
      %40 = vector.load %arg7[%c0_25, %c0_26] : memref<8x256xf32, #tpu.memory_space<vmem>>, vector<8x256xf32>
      tpu.vector_store %arg7[%c0_25, %c0_26], %39 {strides = array<i32>} : memref<8x256xf32, #tpu.memory_space<vmem>>, vector<8x256xf32>,
    } else {
    }
    %c0 = arith.constant 0 : index
    %c0_1 = arith.constant 0 : index
    %c0_2 = arith.constant 0 : index
    %3 = vector.load %arg2[%c0, %c0_1, %c0_2] : memref<1x32x256xf32, #tpu.memory_space<vmem>>, vector<1x32x256xf32>
    %c0_3 = arith.constant 0 : index
    %c0_4 = arith.constant 0 : index
    %c0_5 = arith.constant 0 : index
    %4 = vector.load %arg3[%c0_3, %c0_4, %c0_5] : memref<1x32x256xf32, #tpu.memory_space<vmem>>, vector<1x32x256xf32>
    %c0_6 = arith.constant 0 : index
    %c0_7 = arith.constant 0 : index
    %c0_8 = arith.constant 0 : index
    %5 = vector.load %arg4[%c0_6, %c0_7, %c0_8] : memref<1x32x256xi32, #tpu.memory_space<vmem>>, vector<1x32x256xi32>
    %cst = arith.constant dense<0> : vector<1x32x256xi32>
    %6 = arith.cmpi ne, %5, %cst : vector<1x32x256xi32>
    %7 = arith.extui %6 : vector<1x32x256xi1> to vector<1x32x256xi32>
    %8 = arith.sitofp %7 : vector<1x32x256xi32> to vector<1x32x256xf32>
    %9 = arith.subf %3, %4 : vector<1x32x256xf32>
    %10 = arith.mulf %9, %9 : vector<1x32x256xf32>
    %11 = arith.mulf %10, %8 : vector<1x32x256xf32>
    %c0_9 = arith.constant 0 : index
    %c0_10 = arith.constant 0 : index
    %12 = vector.load %arg6[%c0_9, %c0_10] : memref<8x256xf32, #tpu.memory_space<vmem>>, vector<8x256xf32>
    %cst_11 = arith.constant dense<0.000000e+00> : vector<32x256xf32>
    %13 = vector.multi_reduction <add>, %11, %cst_11 [0] : vector<1x32x256xf32> to vector<32x256xf32>
    %14 = vector.extract_strided_slice %13 {offsets = [0, 0], sizes = [8, 256], strides = [1, 1]} : vector<32x256xf32> to vector<8x256xf32>
    %15 = vector.extract_strided_slice %13 {offsets = [8, 0], sizes = [8, 256], strides = [1, 1]} : vector<32x256xf32> to vector<8x256xf32>
    %16 = arith.addf %14, %15 : vector<8x256xf32>
    %17 = vector.extract_strided_slice %13 {offsets = [16, 0], sizes = [8, 256], strides = [1, 1]} : vector<32x256xf32> to vector<8x256xf32>
    %18 = arith.addf %16, %17 : vector<8x256xf32>
    %19 = vector.extract_strided_slice %13 {offsets = [24, 0], sizes = [8, 256], strides = [1, 1]} : vector<32x256xf32> to vector<8x256xf32>
    %20 = arith.addf %18, %19 : vector<8x256xf32>
    %21 = arith.addf %12, %20 : vector<8x256xf32>
    %c0_12 = arith.constant 0 : index
    %c0_13 = arith.constant 0 : index
    %22 = vector.load %arg6[%c0_12, %c0_13] : memref<8x256xf32, #tpu.memory_space<vmem>>, vector<8x256xf32>
    tpu.vector_store %arg6[%c0_12, %c0_13], %21 {strides = array<i32>} : memref<8x256xf32, #tpu.memory_space<vmem>>, vector<8x256xf32>,
    %c0_14 = arith.constant 0 : index
    %c0_15 = arith.constant 0 : index
    %23 = vector.load %arg7[%c0_14, %c0_15] : memref<8x256xf32, #tpu.memory_space<vmem>>, vector<8x256xf32>
    %cst_16 = arith.constant dense<0.000000e+00> : vector<32x256xf32>
    %24 = vector.multi_reduction <add>, %8, %cst_16 [0] : vector<1x32x256xf32> to vector<32x256xf32>
    %25 = vector.extract_strided_slice %24 {offsets = [0, 0], sizes = [8, 256], strides = [1, 1]} : vector<32x256xf32> to vector<8x256xf32>
    %26 = vector.extract_strided_slice %24 {offsets = [8, 0], sizes = [8, 256], strides = [1, 1]} : vector<32x256xf32> to vector<8x256xf32>
    %27 = arith.addf %25, %26 : vector<8x256xf32>
    %28 = vector.extract_strided_slice %24 {offsets = [16, 0], sizes = [8, 256], strides = [1, 1]} : vector<32x256xf32> to vector<8x256xf32>
    %29 = arith.addf %27, %28 : vector<8x256xf32>
    %30 = vector.extract_strided_slice %24 {offsets = [24, 0], sizes = [8, 256], strides = [1, 1]} : vector<32x256xf32> to vector<8x256xf32>
    %31 = arith.addf %29, %30 : vector<8x256xf32>
    %32 = arith.addf %23, %31 : vector<8x256xf32>
    %c0_17 = arith.constant 0 : index
    %c0_18 = arith.constant 0 : index
    %33 = vector.load %arg7[%c0_17, %c0_18] : memref<8x256xf32, #tpu.memory_space<vmem>>, vector<8x256xf32>
    tpu.vector_store %arg7[%c0_17, %c0_18], %32 {strides = array<i32>} : memref<8x256xf32, #tpu.memory_space<vmem>>, vector<8x256xf32>,
    %c0_i32_19 = arith.constant 0 : i32
    %34 = arith.cmpi eq, %arg1, %c0_i32_19 : i32
    %35 = arith.extui %34 : i1 to i32
    %c0_i32_20 = arith.constant 0 : i32
    %36 = arith.cmpi ne, %35, %c0_i32_20 : i32
    scf.if %36 {
      %c0_21 = arith.constant 0 : index
      %c0_22 = arith.constant 0 : index
      %37 = vector.load %arg6[%c0_21, %c0_22] : memref<8x256xf32, #tpu.memory_space<vmem>>, vector<8x256xf32>
      %38 = vector.shape_cast %37 : vector<8x256xf32> to vector<1x8x256xf32>
      %cst_23 = arith.constant dense<0.000000e+00> : vector<1xf32>
      %39 = vector.multi_reduction <add>, %38, %cst_23 [1, 2] : vector<1x8x256xf32> to vector<1xf32>
      %40 = vector.shape_cast %39 : vector<1xf32> to vector<1x1x1xf32>
      %41 = vector.extract %40[0, 0, 0] : f32 from vector<1x1x1xf32>
      %c0_24 = arith.constant 0 : index
      %c0_25 = arith.constant 0 : index
      %42 = memref.load %arg5[%c0_24, %c0_25] : memref<1x2xf32, #tpu.memory_space<smem>>
      memref.store %41, %arg5[%c0_24, %c0_25] : memref<1x2xf32, #tpu.memory_space<smem>>
      %c0_26 = arith.constant 0 : index
      %c0_27 = arith.constant 0 : index
      %43 = vector.load %arg7[%c0_26, %c0_27] : memref<8x256xf32, #tpu.memory_space<vmem>>, vector<8x256xf32>
      %44 = vector.shape_cast %43 : vector<8x256xf32> to vector<1x8x256xf32>
      %cst_28 = arith.constant dense<0.000000e+00> : vector<1xf32>
      %45 = vector.multi_reduction <add>, %44, %cst_28 [1, 2] : vector<1x8x256xf32> to vector<1xf32>
      %46 = vector.shape_cast %45 : vector<1xf32> to vector<1x1x1xf32>
      %47 = vector.extract %46[0, 0, 0] : f32 from vector<1x1x1xf32>
      %c0_29 = arith.constant 0 : index
      %c1 = arith.constant 1 : index
      %48 = memref.load %arg5[%c0_29, %c1] : memref<1x2xf32, #tpu.memory_space<smem>>
      memref.store %47, %arg5[%c0_29, %c1] : memref<1x2xf32, #tpu.memory_space<smem>>
    } else {
    }
    return
  }
  func.func @transform_0(%arg0: i32, %arg1: i32) -> (i32, i32, i32) {
    %c1_i32 = arith.constant 1 : i32
    %0 = arith.muli %arg0, %c1_i32 : i32
    %1 = arith.addi %0, %arg1 : i32
    %c0_i32 = arith.constant 0 : i32
    %c0_i32_0 = arith.constant 0 : i32
    %c0_i32_1 = arith.constant 0 : i32
    return %c0_i32, %c0_i32_0, %1 : i32, i32, i32
  }
  func.func @transform_1(%arg0: i32, %arg1: i32) -> (i32, i32, i32) {
    %c1_i32 = arith.constant 1 : i32
    %0 = arith.muli %arg0, %c1_i32 : i32
    %1 = arith.addi %0, %arg1 : i32
    %c0_i32 = arith.constant 0 : i32
    %c0_i32_0 = arith.constant 0 : i32
    %c0_i32_1 = arith.constant 0 : i32
    return %c0_i32, %c0_i32_0, %1 : i32, i32, i32
  }
  func.func @transform_2(%arg0: i32, %arg1: i32) -> (i32, i32, i32) {
    %c1_i32 = arith.constant 1 : i32
    %0 = arith.muli %arg0, %c1_i32 : i32
    %1 = arith.addi %0, %arg1 : i32
    %c0_i32 = arith.constant 0 : i32
    %c0_i32_0 = arith.constant 0 : i32
    %c0_i32_1 = arith.constant 0 : i32
    return %c0_i32, %c0_i32_0, %1 : i32, i32, i32
  }
  func.func @transform_3(%arg0: i32, %arg1: i32) -> (i32, i32) {
    %c0_i32 = arith.constant 0 : i32
    %c0_i32_0 = arith.constant 0 : i32
    return %arg0, %c0_i32 : i32, i32
  }
}

</mosaic_0001>

<bundles_post_ra>
// kernel: tpu_custom_call.1
= control target key start
LH: loop header
LB: loop body
LE: loop exit
PB: predicated region body
PF: predicated region fallthrough
CT: control target
= control target key end

     0   :  { %8 = vsyncpa [#allocation5], 0  ;;  %s406_s0 = inlined_call_operand.vmem [shape: f32[1,32,256], index: 0, kind: input, shape index: {}]   ;;  %s407_s1 = inlined_call_operand.hbm [shape: f32[1,32,256], index: 1, kind: input, shape index: {}]   ;;  %s408_s2 = inlined_call_operand.vmem [shape: s32[1,32,256], index: 2, kind: input, shape index: {}]   ;;  %s409_s3 = inlined_call_operand.hbm [shape: f32[1,2], index: 3, kind: output, shape index: {}]  }
   0x1   :  { %9 = vsyncpa [#allocation6], 0  ;;  %s309_s12 = smov [#allocation4]   ;;  %s273_s16 = scalar_lea.hbm %s407_s1, 1024 }
   0x2   :  { %s29_s13 = sshll.u32 %s309_s12, 4  ;;  %p274_p0 = scmp.ne.s32.totalorder %s407_s1, %s273_s16  ;;  %s30_s13 = int_to_ptr.vmem [resolvable:$true] %s29_s13 }
   0x3   :  { %p277_p1 = scmp.lt.u32.totalorder %s273_s16, %s407_s1 }
   0x5   :  { %p279_p2 = pnand %p277_p1, %p274_p0 }
   0x7   :  { %282 = shalt.err (!%p279_p2)
}
   0x8   :  { %s283_s21 = scalar_lea.vmem %s30_s13, 1024  ;;  %p288_p4 = scmp.lt.s32.totalorder %s30_s13, %s30_s13 }
   0x9   :  { %p284_p3 = scmp.ne.s32.totalorder %s30_s13, %s283_s21  ;;  %p289_p5 = scmp.lt.s32.totalorder %s283_s21, %s283_s21 }
   0xb   :  { %p290_p6 = por %p289_p5, %p288_p4 }
   0xd   :  { %p291_p7 = pnand %p290_p6, %p284_p3 }
   0xf   :  { %294 = shalt.err (!%p291_p7)
}
  0x10   :  { %s310_s22 = smov 256   ;;  %s311_s23 = smov 16  }
  0x11   :  { %35 = dma.hbm_to_vmem [thread:$0]  %s407_s1, 1024, %s30_s13, [#allocation5], %s310_s22, %s310_s22, %s311_s23  }
  0x12   :  { %305 = dma.done.wait [#allocation5], 1024  }
  0x13   :  { %306 = vsyncadd [#allocation5], 4294966272  ;;  %v87_v0 = vld [vmem:[%s406_s0] sm:$0xff]  ;;  %v88_v1 = vld [vmem:[%s406_s0 + $0x8] sm:$0xff]  ;;  %v312_v35 = vmov 0.0   ;;  %s295_s5 = scalar_lea.hbm %s409_s3, 16 }
  0x14   :  { %v89_v2 = vld [vmem:[%s406_s0 + $0x10] sm:$0xff]  ;;  %v90_v3 = vld [vmem:[%s406_s0 + $0x18] sm:$0xff]  ;;  %v91_v4 = vld [vmem:[%s406_s0 + $0x20] sm:$0xff]  ;;  %p296_p8 = scmp.ne.s32.totalorder %s409_s3, %s295_s5  ;;  %p299_p9 = scmp.lt.u32.totalorder %s295_s5, %s409_s3 }
  0x15   :  { %v92_v5 = vld [vmem:[%s406_s0 + $0x28] sm:$0xff]  ;;  %v93_v6 = vld [vmem:[%s406_s0 + $0x30] sm:$0xff]  ;;  %v94_v7 = vld [vmem:[%s406_s0 + $0x38] sm:$0xff] }
  0x16   :  { %v95_v8 = vld [vmem:[#allocation4] sm:$0xff]  ;;  %v96_v9 = vld [vmem:[#allocation4 + $0x8] sm:$0xff]  ;;  %v97_v10 = vld [vmem:[#allocation4 + $0x10] sm:$0xff]  ;;  %p301_p10 = pnand %p299_p9, %p296_p8 }
  0x17   :  { %v98_v11 = vld [vmem:[#allocation4 + $0x18] sm:$0xff]  ;;  %v135_v12 = vsub.f32 %v87_v0, %v95_v8  ;;  %v99_v13 = vld [vmem:[#allocation4 + $0x20] sm:$0xff]  ;;  %v100_v14 = vld [vmem:[#allocation4 + $0x28] sm:$0xff]  ;;  %v136_v16 = vsub.f32 %v88_v1, %v96_v9  ;;  %v137_v17 = vsub.f32 %v89_v2, %v97_v10 }
  0x18   :  { %v101_v15 = vld [vmem:[#allocation4 + $0x30] sm:$0xff]  ;;  %v138_v18 = vsub.f32 %v90_v3, %v98_v11  ;;  %v102_v19 = vld [vmem:[#allocation4 + $0x38] sm:$0xff]  ;;  %v103_v20 = vld [vmem:[%s408_s2] sm:$0xff]  ;;  %v139_v22 = vsub.f32 %v91_v4, %v99_v13  ;;  %v140_v23 = vsub.f32 %v92_v5, %v100_v14 }
  0x19   :  { %v104_v21 = vld [vmem:[%s408_s2 + $0x8] sm:$0xff]  ;;  %v141_v24 = vsub.f32 %v93_v6, %v101_v15  ;;  %v143_v25 = vmul.f32 %v135_v12, %v135_v12  ;;  %v105_v26 = vld [vmem:[%s408_s2 + $0x10] sm:$0xff]  ;;  %v106_v27 = vld [vmem:[%s408_s2 + $0x18] sm:$0xff]  ;;  %vm111_vm0 = vcmp.ne.s32.totalorder %v103_v20, 0  ;;  %v142_v29 = vsub.f32 %v94_v7, %v102_v19 }
  0x1a   :  { %v107_v28 = vld [vmem:[%s408_s2 + $0x20] sm:$0xff]  ;;  %vm112_vm1 = vcmp.ne.s32.totalorder %v104_v21, 0  ;;  %v144_v30 = vmul.f32 %v136_v16, %v136_v16  ;;  %v108_v31 = vld [vmem:[%s408_s2 + $0x28] sm:$0xff]  ;;  %v109_v32 = vld [vmem:[%s408_s2 + $0x30] sm:$0xff]  ;;  %vm113_vm2 = vcmp.ne.s32.totalorder %v105_v26, 0  ;;  %vm114_vm3 = vcmp.ne.s32.totalorder %v106_v27, 0 }
  0x1b   :  { %v110_v33 = vld [vmem:[%s408_s2 + $0x38] sm:$0xff]  ;;  %vm115_vm4 = vcmp.ne.s32.totalorder %v107_v28, 0  ;;  %v145_v34 = vmul.f32 %v137_v17, %v137_v17  ;;  %vm116_vm5 = vcmp.ne.s32.totalorder %v108_v31, 0  ;;  %vm117_vm6 = vcmp.ne.s32.totalorder %v109_v32, 0 }
  0x1c   :  { %vm118_vm7 = vcmp.ne.s32.totalorder %v110_v33, 0  ;;  %v256_v36 = vsel %vm111_vm0, 1.0, %v312_v35  ;;  %v257_v37 = vsel %vm112_vm1, 1.0, %v312_v35  ;;  %v258_v38 = vsel %vm113_vm2, 1.0, %v312_v35 }
  0x1d   :  { %v259_v39 = vsel %vm114_vm3, 1.0, %v312_v35  ;;  %v260_v40 = vsel %vm115_vm4, 1.0, %v312_v35  ;;  %v261_v41 = vsel %vm116_vm5, 1.0, %v312_v35  ;;  %v262_v42 = vsel %vm117_vm6, 1.0, %v312_v35 }
  0x1e   :  { %v263_v43 = vsel %vm118_vm7, 1.0, %v312_v35  ;;  %v146_v44 = vmul.f32 %v138_v18, %v138_v18  ;;  %v147_v45 = vmul.f32 %v139_v22, %v139_v22  ;;  %v148_v46 = vmul.f32 %v140_v23, %v140_v23 }
  0x1f   :  { %v149_v47 = vmul.f32 %v141_v24, %v141_v24  ;;  %v150_v48 = vmul.f32 %v142_v29, %v142_v29  ;;  %v151_v49 = vmul.f32 %v256_v36, %v143_v25  ;;  %v152_v50 = vmul.f32 %v257_v37, %v144_v30 }
  0x20   :  { %v153_v51 = vmul.f32 %v258_v38, %v145_v34  ;;  %v154_v52 = vmul.f32 %v259_v39, %v146_v44  ;;  %v155_v53 = vmul.f32 %v260_v40, %v147_v45  ;;  %v156_v54 = vmul.f32 %v261_v41, %v148_v46 }
  0x21   :  { %v157_v55 = vmul.f32 %v262_v42, %v149_v47  ;;  %v158_v56 = vmul.f32 %v263_v43, %v150_v48  ;;  %v189_v59 = vadd.f32 %v258_v38, %v256_v36  ;;  %v190_v60 = vadd.f32 %v259_v39, %v257_v37 }
  0x22   :  { %v169_v57 = vadd.f32 %v153_v51, %v151_v49  ;;  %v170_v58 = vadd.f32 %v154_v52, %v152_v50 }
  0x23   :  { %v191_v63 = vadd.f32 %v260_v40, %v189_v59  ;;  %v192_v0 = vadd.f32 %v261_v41, %v190_v60 }
  0x24   :  { %v171_v61 = vadd.f32 %v169_v57, %v155_v53  ;;  %v172_v62 = vadd.f32 %v170_v58, %v156_v54 }
  0x25   :  { %v193_v3 = vadd.f32 %v262_v42, %v191_v63  ;;  %v194_v4 = vadd.f32 %v263_v43, %v192_v0 }
  0x26   :  { %v173_v1 = vadd.f32 %v171_v61, %v157_v55  ;;  %v174_v2 = vadd.f32 %v172_v62, %v158_v56 }
  0x27   :  { %v218_v6 = vadd.f32 %v194_v4, %v193_v3 }
  0x28   :  { %v204_v5 = vadd.f32 %v174_v2, %v173_v1 }
  0x2a   :  { %205 = vadd.xlane.f32.xlu0 %v204_v5 }
  0x2e   :  { %219 = vadd.xlane.f32.xlu0 %v218_v6 }
  0xb7   :  { %v206_v7 = vpop.xlane.xlu0 %205 }
  0xb8   :  { %v207_v8 = vrot.slane %v206_v7, 4 }
  0xba   :  { %v208_v9 = vadd.f32 %v207_v8, %v206_v7 }
  0xbb   :  { %v220_v10 = vpop.xlane.xlu0 %219 }
  0xbc   :  { %v209_v11 = vrot.slane %v208_v9, 2  ;;  %v221_v12 = vrot.slane %v220_v10, 4 }
  0xbe   :  { %v222_v13 = vadd.f32 %v221_v12, %v220_v10  ;;  %v210_v14 = vadd.f32 %v209_v11, %v208_v9 }
  0xc0   :  { %v223_v15 = vrot.slane %v222_v13, 2  ;;  %v211_v16 = vrot.slane %v210_v14, 1 }
  0xc2   :  { %v224_v17 = vadd.f32 %v223_v15, %v222_v13  ;;  %v212_v18 = vadd.f32 %v211_v16, %v210_v14 }
  0xc4   :  { %264 = vpush %v212_v18  ;;  %v225_v19 = vrot.slane %v224_v17, 1 }
  0xc6   :  { %v226_v20 = vadd.f32 %v225_v19, %v224_v17 }
  0xc8   :  { %266 = vpush %v226_v20 }
  0xf5   :  { %s265_s2 = spop %264 }
  0xf6   :  { %215 = sst [smem:[#allocation7]] %s265_s2 }
  0xf9   :  { %s267_s29 = spop %266 }
  0xfa   :  { %229 = sst [smem:[#allocation7 + $0x1]] %s267_s29 }
  0xfb   :  { %304 = shalt.err (!%p301_p10)
}
  0xfc   :  { %s313_s9 = smov [#allocation7]  }
  0xfd   :  { %237 = dma.smem_to_hbm %s313_s9, 16, %s409_s3, [#allocation6]  }
  0xfe   :  { %307 = dma.done.wait [#allocation6], 16  }
  0xff   :  { %308 = vsyncadd [#allocation6], 4294967280 }
 0x100   :  { %241 = sfence }
 0x101   :  { %242 = vsyncpa [#allocation5], 1 }
 0x102   :  { %243 = vsyncpa [#allocation6], 1 }

</bundles_post_ra>
